<compile_context>
chip_gen: v5e
topology: v5e:2x2
jax: 0.10.0
libtpu: 0.0.40
codegen_flags: <defaults>
</compile_context>

<pallas_src>
import math

import jax
import jax.numpy as jnp
from jax.experimental import pallas as pl
from jax.experimental.pallas import tpu as pltpu


MXU_DTYPE = jnp.bfloat16  # matmul-input dtype; accumulation is always f32.


def _rmsnorm(x, w, eps):
    var = jnp.mean(x * x, axis=-1, keepdims=True)
    return (x * jax.lax.rsqrt(var + eps)) * w


# ---------------------------------------------------------------------------
# Tile pickers — respect the (8, 128) BlockSpec divisibility rule.
# ---------------------------------------------------------------------------
def _pick_sublane_tile(n, cap):
    """Largest divisor of n that is <= cap and a multiple of 8 (else n)."""
    if n <= cap:
        return n
    for d in range(min(cap, n), 0, -1):
        if n % d == 0 and d % 8 == 0:
            return d
    return n


def _pick_lane_tile(n, cap):
    """Largest divisor of n that is <= cap and a multiple of 128 (else n)."""
    if n <= cap:
        return n
    for d in range(min(cap, n), 0, -1):
        if n % d == 0 and d % 128 == 0:
            return d
    return n


def _pick_kv_head_tile(Hkv, groups, Dk, cap):
    """Largest kv-head block so that both the q and k/v weight N-tiles are
    lane-aligned (multiple of 128) and the q tile stays under `cap` columns.
    Falls back to Hkv (full-width weights) for tiny models."""
    for d in range(Hkv, 0, -1):
        if (Hkv % d == 0 and groups * d * Dk <= cap
                and (d * Dk) % 128 == 0 and (groups * d * Dk) % 128 == 0):
            return d
    return Hkv


# ---------------------------------------------------------------------------
# Kernel 1: attn_norm + (N-tiled) QKV projection + RoPE, head-major outputs.
# ---------------------------------------------------------------------------
def _make_qkv_rope_kernel(tq, groups, hkv_blk, Dk, eps):
    nh_q = groups * hkv_blk   # query heads produced per grid step
    nh_k = hkv_blk            # kv heads produced per grid step
    half = Dk // 2

    def kernel(x_ref, nw_ref, cos_ref, sin_ref, qw_ref, kw_ref, vw_ref,
               q_out, k_out, v_out, h_sc):
        j = pl.program_id(2)

        @pl.when(j == 0)
        def _init():
            x = x_ref[...].astype(jnp.float32)                  # (tq, hidden)
            h_sc[...] = _rmsnorm(x, nw_ref[...], eps).astype(MXU_DTYPE)

        h = h_sc[...]                                           # (tq, hidden) bf16
        cos = cos_ref[...][:, None, :]                          # (tq, 1, Dk)
        sin = sin_ref[...][:, None, :]                          # sign-folded sin

        def rope_headmajor(t, nh):
            t3 = t.reshape(tq, nh, Dk)
            # rotate-half via roll (concat of two static lane slices; XLU only).
            tr = jnp.concatenate([t3[..., half:], t3[..., :half]], axis=-1)
            t3 = t3 * cos + tr * sin
            return jnp.swapaxes(t3, 0, 1)                       # (nh, tq, Dk)

        q = jnp.dot(h, qw_ref[...], preferred_element_type=jnp.float32)
        q_out[...] = rope_headmajor(q, nh_q).astype(q_out.dtype)

        k = jnp.dot(h, kw_ref[...], preferred_element_type=jnp.float32)
        k_out[...] = rope_headmajor(k, nh_k).astype(k_out.dtype)

        v = jnp.dot(h, vw_ref[...], preferred_element_type=jnp.float32)
        v3 = v.reshape(tq, nh_k, Dk)
        v_out[...] = jnp.swapaxes(v3, 0, 1).astype(v_out.dtype)

    return kernel


# ---------------------------------------------------------------------------
# Kernel 2: GQA-packed causal flash attention (online softmax).
# q/k/v arrive head-major; GQA handled by packing query heads of a kv group
# into the M dimension (no k/v duplication).  Mask only on diagonal tiles.
# ---------------------------------------------------------------------------
def _make_flash_attn_kernel(tq, tk, H, Hkv, Dk):
    groups = H // Hkv
    GT = groups * tq

    def kernel(q_ref, k_ref, v_ref, o_ref, m_sc, l_sc, acc_sc):
        qi = pl.program_id(1)
        ki = pl.program_id(2)

        @pl.when(ki == 0)
        def _init():
            m_sc[...] = jnp.full((Hkv, GT), -1e30, jnp.float32)
            l_sc[...] = jnp.zeros((Hkv, GT), jnp.float32)
            acc_sc[...] = jnp.zeros((Hkv, GT, Dk), jnp.float32)

        def scores():
            # (H, tq, Dk) -> (Hkv, groups*tq, Dk): query heads of one kv group
            # stacked along M (head = kv*groups + g).
            q = q_ref[...].reshape(Hkv, GT, Dk)
            return jnp.einsum('gqd,gkd->gqk', q, k_ref[...],
                              preferred_element_type=jnp.float32)

        def update(s):
            m_prev = m_sc[...]
            m_new = jnp.maximum(m_prev, jnp.max(s, axis=-1))
            alpha = jnp.exp(m_prev - m_new)
            # TODO(synk): on v6e/v7x a bf16 exp would use the bf16 EUP path.
            p = jnp.exp(s - m_new[..., None])
            l_sc[...] = alpha * l_sc[...] + jnp.sum(p, axis=-1)
            acc_sc[...] = alpha[..., None] * acc_sc[...] + jnp.einsum(
                'gqk,gkd->gqd', p.astype(MXU_DTYPE), v_ref[...],
                preferred_element_type=jnp.float32)
            m_sc[...] = m_new

        @pl.when(ki < qi)          # fully-visible kv tile: no mask work at all
        def _off_diag():
            update(scores())

        @pl.when(ki == qi)         # diagonal tile: build + apply causal mask
        def _diag():
            s = scores()
            rows = jax.lax.broadcasted_iota(jnp.int32, (GT, tk), 0)
            cols = jax.lax.broadcasted_iota(jnp.int32, (GT, tk), 1)
            causal = cols <= (rows % tq)          # tq == tk
            s = jnp.where(causal[None, :, :], s, -1e30)
            update(s)

        # ki > qi: fully masked tile, skipped entirely.

        @pl.when(ki == pl.num_programs(2) - 1)
        def _finalize():
            inv_l = pl.reciprocal(l_sc[...], approx=True)       # EUP slot
            out = acc_sc[...] * inv_l[..., None]                # (Hkv, GT, Dk)
            out = out.reshape(H, tq, Dk)                        # head-major
            out = jnp.swapaxes(out, 0, 1).reshape(tq, H * Dk)
            o_ref[...] = out.astype(o_ref.dtype)

    return kernel


# ---------------------------------------------------------------------------
# Kernel 3: o-projection (K-tiled reduction) + residual add + mlp_norm.
# ---------------------------------------------------------------------------
def _make_oproj_norm_kernel(eps):
    def kernel(x_ref, a_ref, ow_ref, nw_ref, resid_out, h2_out, acc_sc):
        j = pl.program_id(1)

        @pl.when(j == 0)
        def _init():
            acc_sc[...] = jnp.zeros_like(acc_sc)

        acc_sc[...] += jnp.dot(a_ref[...], ow_ref[...],
                               preferred_element_type=jnp.float32)

        @pl.when(j == pl.num_programs(1) - 1)
        def _finalize():
            resid = x_ref[...].astype(jnp.float32) + acc_sc[...]
            resid_out[...] = resid.astype(resid_out.dtype)
            h2_out[...] = _rmsnorm(resid, nw_ref[...], eps).astype(h2_out.dtype)

    return kernel


# ---------------------------------------------------------------------------
# Kernel 4: SwiGLU MLP (intermediate-dim reduction) + final residual add.
# ---------------------------------------------------------------------------
def _make_mlp_kernel():
    def kernel(r_ref, h2_ref, gw_ref, uw_ref, dw_ref, out_ref, acc_sc):
        j = pl.program_id(1)

        @pl.when(j == 0)
        def _init():
            acc_sc[...] = jnp.zeros_like(acc_sc)

        h2 = h2_ref[...]
        g = jnp.dot(h2, gw_ref[...], preferred_element_type=jnp.float32)
        u = jnp.dot(h2, uw_ref[...], preferred_element_type=jnp.float32)
        m = (g * jax.lax.logistic(g)) * u                      # silu(g) * u
        acc_sc[...] += jnp.dot(m.astype(MXU_DTYPE), dw_ref[...],
                               preferred_element_type=jnp.float32)

        @pl.when(j == pl.num_programs(1) - 1)
        def _finalize():
            out_ref[...] = (r_ref[...].astype(jnp.float32)
                            + acc_sc[...]).astype(out_ref.dtype)

    return kernel


# ---------------------------------------------------------------------------
# Wrapper
# ---------------------------------------------------------------------------
def rodimus_block_forward(x, params, *, num_heads, num_kv_heads, eps=1e-6,
                          rope_theta=10000.0,
                          q_tile=128,           # 256 on v5e/v6e, 128 on v7x
                          qkv_n_tile=512,       # q-projection N tile (columns)
                          o_k_tile=512,         # o-projection K tile
                          mlp_token_tile=256,   # kernels 3/4 token tile (B*T)
                          interm_tile=512):     # 256 on v7x
    B, T, hidden = x.shape
    H, Hkv = num_heads, num_kv_heads
    assert hidden % H == 0 and H % Hkv == 0
    Dk = hidden // H
    assert Dk % 2 == 0
    groups = H // Hkv
    HDk, KDk = H * Dk, Hkv * Dk
    intermediate = params["gate_w"].shape[1]
    BT = B * T
    f32 = jnp.float32

    # --- tiling (all tiles divide their axes and satisfy the (8,128) rule) ---
    tq = _pick_sublane_tile(T, q_tile)
    tk = tq
    nq = T // tq
    hkv_blk = _pick_kv_head_tile(Hkv, groups, Dk, qkv_n_tile)
    n_hblk = Hkv // hkv_blk
    nh_q, nh_k = groups * hkv_blk, hkv_blk
    ko = _pick_lane_tile(HDk, o_k_tile)
    n_ko = HDk // ko
    ti = _pick_lane_tile(intermediate, interm_tile)
    ni = intermediate // ti
    tm = _pick_sublane_tile(BT, mlp_token_tile)
    nt = BT // tm

    # --- host-side glue: RoPE tables with sign-folded sin ---------------------
    half = Dk // 2
    inv_freq = 1.0 / (rope_theta ** (jnp.arange(0, Dk, 2, dtype=f32) / Dk))
    freqs = jnp.arange(T, dtype=f32)[:, None] * inv_freq[None, :]   # (T, Dk/2)
    cos = jnp.concatenate([jnp.cos(freqs), jnp.cos(freqs)], axis=-1)  # (T, Dk)
    sin_signed = jnp.concatenate([-jnp.sin(freqs), jnp.sin(freqs)], axis=-1)

    # bf16 weights feed the MXU; norm weights stay f32.  The softmax scale is
    # folded into q_w (free; commutes with the RoPE rotation).
    scale = 1.0 / math.sqrt(Dk)
    qw = (params["q_w"] * scale).astype(MXU_DTYPE)
    kw = params["k_w"].astype(MXU_DTYPE)
    vw = params["v_w"].astype(MXU_DTYPE)
    ow = params["o_w"].astype(MXU_DTYPE)
    gw = params["gate_w"].astype(MXU_DTYPE)
    uw = params["up_w"].astype(MXU_DTYPE)
    dw = params["down_w"].astype(MXU_DTYPE)
    anw = params["attn_norm_w"].astype(f32)
    mnw = params["mlp_norm_w"].astype(f32)

    def cparams(sem):
        return pltpu.CompilerParams(dimension_semantics=sem,
                                    vmem_limit_bytes=48 * 1024 * 1024)

    # ---- 1) attn_norm + QKV projection (N-tiled) + RoPE (head-major out) -----
    qkv_kernel = _make_qkv_rope_kernel(tq, groups, hkv_blk, Dk, eps)
    q, k, v = pl.pallas_call(
        qkv_kernel,
        out_shape=(jax.ShapeDtypeStruct((B, H, T, Dk), MXU_DTYPE),
                   jax.ShapeDtypeStruct((B, Hkv, T, Dk), MXU_DTYPE),
                   jax.ShapeDtypeStruct((B, Hkv, T, Dk), MXU_DTYPE)),
        grid_spec=pltpu.PrefetchScalarGridSpec(
            num_scalar_prefetch=0,
            grid=(B, nq, n_hblk),
            in_specs=[
                pl.BlockSpec((None, tq, hidden), lambda b, i, j: (b, i, 0)),
                pl.BlockSpec((1, hidden), lambda b, i, j: (0, 0)),
                pl.BlockSpec((tq, Dk), lambda b, i, j: (i, 0)),
                pl.BlockSpec((tq, Dk), lambda b, i, j: (i, 0)),
                pl.BlockSpec((hidden, nh_q * Dk), lambda b, i, j: (0, j)),
                pl.BlockSpec((hidden, nh_k * Dk), lambda b, i, j: (0, j)),
                pl.BlockSpec((hidden, nh_k * Dk), lambda b, i, j: (0, j)),
            ],
            out_specs=[
                pl.BlockSpec((None, nh_q, tq, Dk), lambda b, i, j: (b, j, i, 0)),
                pl.BlockSpec((None, nh_k, tq, Dk), lambda b, i, j: (b, j, i, 0)),
                pl.BlockSpec((None, nh_k, tq, Dk), lambda b, i, j: (b, j, i, 0)),
            ],
            scratch_shapes=[pltpu.VMEM((tq, hidden), MXU_DTYPE)]),
        compiler_params=cparams(("parallel", "parallel", "arbitrary")),
        cost_estimate=pl.CostEstimate(
            flops=int(2 * B * T * hidden * (HDk + 2 * KDk)),
            transcendentals=int(B * T),
            bytes_accessed=int(4 * B * T * hidden
                               + 2 * B * nq * hidden * (HDk + 2 * KDk)
                               + 2 * B * T * (HDk + 2 * KDk))),
    )(x, anw, cos, sin_signed, qw, kw, vw)

    # ---- 2) GQA-packed causal flash attention --------------------------------
    attn_kernel = _make_flash_attn_kernel(tq, tk, H, Hkv, Dk)
    attn_out = pl.pallas_call(
        attn_kernel,
        out_shape=jax.ShapeDtypeStruct((B, T, HDk), MXU_DTYPE),
        grid_spec=pltpu.PrefetchScalarGridSpec(
            num_scalar_prefetch=0,
            grid=(B, nq, nq),
            in_specs=[
                pl.BlockSpec((None, H, tq, Dk), lambda b, i, j: (b, 0, i, 0)),
                # clamp kv block index so skipped (masked) steps don't re-DMA
                pl.BlockSpec((None, Hkv, tk, Dk),
                             lambda b, i, j: (b, 0, jnp.minimum(j, i), 0)),
                pl.BlockSpec((None, Hkv, tk, Dk),
                             lambda b, i, j: (b, 0, jnp.minimum(j, i), 0)),
            ],
            out_specs=pl.BlockSpec((None, tq, HDk), lambda b, i, j: (b, i, 0)),
            scratch_shapes=[pltpu.VMEM((Hkv, groups * tq), jnp.float32),
                            pltpu.VMEM((Hkv, groups * tq), jnp.float32),
                            pltpu.VMEM((Hkv, groups * tq, Dk), jnp.float32)]),
        compiler_params=cparams(("parallel", "parallel", "arbitrary")),
        cost_estimate=pl.CostEstimate(
            flops=int(2 * B * H * T * T * Dk),          # halved for causality
            transcendentals=int(B * H * T * T // 2),
            bytes_accessed=int(2 * B * T * HDk * 2
                               + 2 * B * KDk * tk * (nq * (nq + 1)))),
    )(q, k, v)

    # ---- 3) o-projection (K-reduction) + residual + mlp_norm -----------------
    x2 = x.reshape(BT, hidden)
    a2 = attn_out.reshape(BT, HDk)
    oproj_kernel = _make_oproj_norm_kernel(eps)
    resid, h2 = pl.pallas_call(
        oproj_kernel,
        out_shape=(jax.ShapeDtypeStruct((BT, hidden), jnp.float32),
                   jax.ShapeDtypeStruct((BT, hidden), MXU_DTYPE)),
        grid_spec=pltpu.PrefetchScalarGridSpec(
            num_scalar_prefetch=0,
            grid=(nt, n_ko),
            in_specs=[
                pl.BlockSpec((tm, hidden), lambda i, j: (i, 0)),
                pl.BlockSpec((tm, ko), lambda i, j: (i, j)),
                pl.BlockSpec((ko, hidden), lambda i, j: (j, 0)),
                pl.BlockSpec((1, hidden), lambda i, j: (0, 0)),
            ],
            out_specs=[pl.BlockSpec((tm, hidden), lambda i, j: (i, 0)),
                       pl.BlockSpec((tm, hidden), lambda i, j: (i, 0))],
            scratch_shapes=[pltpu.VMEM((tm, hidden), jnp.float32)]),
        compiler_params=cparams(("parallel", "arbitrary")),
        cost_estimate=pl.CostEstimate(
            flops=int(2 * BT * HDk * hidden),
            transcendentals=int(BT),
            bytes_accessed=int(4 * BT * hidden + 2 * BT * HDk
                               + 2 * nt * HDk * hidden + 6 * BT * hidden)),
    )(x2, a2, ow, mnw)

    # ---- 4) SwiGLU MLP (intermediate reduction) + final residual -------------
    mlp_kernel = _make_mlp_kernel()
    out2 = pl.pallas_call(
        mlp_kernel,
        out_shape=jax.ShapeDtypeStruct((BT, hidden), x.dtype),
        grid_spec=pltpu.PrefetchScalarGridSpec(
            num_scalar_prefetch=0,
            grid=(nt, ni),
            in_specs=[
                pl.BlockSpec((tm, hidden), lambda i, j: (i, 0)),
                pl.BlockSpec((tm, hidden), lambda i, j: (i, 0)),
                pl.BlockSpec((hidden, ti), lambda i, j: (0, j)),
                pl.BlockSpec((hidden, ti), lambda i, j: (0, j)),
                pl.BlockSpec((ti, hidden), lambda i, j: (j, 0)),
            ],
            out_specs=pl.BlockSpec((tm, hidden), lambda i, j: (i, 0)),
            scratch_shapes=[pltpu.VMEM((tm, hidden), jnp.float32)]),
        compiler_params=cparams(("parallel", "arbitrary")),
        cost_estimate=pl.CostEstimate(
            flops=int(2 * BT * hidden * intermediate * 3),
            transcendentals=int(BT * intermediate),
            bytes_accessed=int(6 * BT * hidden
                               + 2 * nt * 3 * hidden * intermediate
                               + 4 * BT * hidden)),
    )(resid, h2, gw, uw, dw)

    return out2.reshape(B, T, hidden)


# ---------------------------------------------------------------------------
# Pure-JAX reference (f32) for correctness validation.
# ---------------------------------------------------------------------------
def _reference(x, params, num_heads, num_kv_heads, eps, rope_theta):
    B, T, hidden = x.shape
    H, Hkv = num_heads, num_kv_heads
    Dk = hidden // H
    groups = H // Hkv
    f32 = jnp.float32

    def rms(t, w):
        var = jnp.mean(t * t, axis=-1, keepdims=True)
        return t * jax.lax.rsqrt(var + eps) * w

    anw = params["attn_norm_w"].reshape(hidden)
    mnw = params["mlp_norm_w"].reshape(hidden)

    resid = x
    h = rms(x, anw)
    q = (h @ params["q_w"]).reshape(B, T, H, Dk)
    k = (h @ params["k_w"]).reshape(B, T, Hkv, Dk)
    v = (h @ params["v_w"]).reshape(B, T, Hkv, Dk)

    half = Dk // 2
    inv_freq = 1.0 / (rope_theta ** (jnp.arange(0, Dk, 2, dtype=f32) / Dk))
    freqs = jnp.arange(T, dtype=f32)[:, None] * inv_freq[None, :]
    cos = jnp.concatenate([jnp.cos(freqs)] * 2, axis=-1)[None, :, None, :]
    sin = jnp.concatenate([jnp.sin(freqs)] * 2, axis=-1)[None, :, None, :]

    def rope(t):
        t1, t2 = t[..., :half], t[..., half:]
        return t * cos + jnp.concatenate([-t2, t1], axis=-1) * sin

    q, k = rope(q), rope(k)
    k = jnp.repeat(k, groups, axis=2)
    v = jnp.repeat(v, groups, axis=2)

    s = jnp.einsum('bthd,bshd->bhts', q, k) / math.sqrt(Dk)
    mask = jnp.tril(jnp.ones((T, T), bool))
    s = jnp.where(mask[None, None], s, -jnp.inf)
    p = jax.nn.softmax(s, axis=-1)
    o = jnp.einsum('bhts,bshd->bthd', p, v).reshape(B, T, H * Dk)

    h = o @ params["o_w"]
    h = resid + h
    resid = h
    h2 = rms(h, mnw)
    g = h2 @ params["gate_w"]
    u = h2 @ params["up_w"]
    m = (g * jax.nn.sigmoid(g)) * u
    return resid + m @ params["down_w"]


def init_params(key, hidden, num_heads, num_kv_heads, intermediate):
    head_dim = hidden // num_heads
    ks = jax.random.split(key, 7)
    std = 0.02
    return {
        # RMSNorm weights init to ones (as in nn.RMSNorm).
        "attn_norm_w": jnp.ones((1, hidden), jnp.float32),
        "mlp_norm_w": jnp.ones((1, hidden), jnp.float32),
        # Linear weights stored (in, out)  (transpose of torch nn.Linear.weight).
        "q_w": std * jax.random.normal(ks[0], (hidden, num_heads * head_dim), jnp.float32),
        "k_w": std * jax.random.normal(ks[1], (hidden, num_kv_heads * head_dim), jnp.float32),
        "v_w": std * jax.random.normal(ks[2], (hidden, num_kv_heads * head_dim), jnp.float32),
        "o_w": std * jax.random.normal(ks[3], (num_heads * head_dim, hidden), jnp.float32),
        "gate_w": std * jax.random.normal(ks[4], (hidden, intermediate), jnp.float32),
        "up_w": std * jax.random.normal(ks[5], (hidden, intermediate), jnp.float32),
        "down_w": std * jax.random.normal(ks[6], (intermediate, hidden), jnp.float32),
    }


if __name__ == "__main__":
    # Small config: hidden_size=32, intermediate=128 (align_multiple(4*32, 8)),
    # num_heads=4, num_kv_heads=2 (GQA), head_dim=8, batch=2, seq=8.
    B, T, hidden = 2, 8, 32
    num_heads, num_kv_heads = 4, 2
    intermediate = 128

    key = jax.random.PRNGKey(0)
    kx, kp = jax.random.split(key)
    x = jax.random.normal(kx, (B, T, hidden), jnp.float32)
    params = init_params(kp, hidden, num_heads, num_kv_heads, intermediate)

    out = rodimus_block_forward(x, params, num_heads=num_heads,
                                num_kv_heads=num_kv_heads, eps=1e-6,
                                rope_theta=10000.0)
    out = jax.block_until_ready(out)
    assert out.shape == (B, T, hidden) and out.dtype == jnp.float32

    ref = _reference(x, params, num_heads, num_kv_heads, 1e-6, 10000.0)
    max_err = float(jnp.max(jnp.abs(out - ref)))
    assert bool(jnp.allclose(out, ref, rtol=3e-2, atol=3e-2)), max_err
    print("KERNEL_OK")
</pallas_src>

<mosaic_0001>
module attributes {stable_mosaic.version = 11 : i64} {
  func.func @kernel(%arg0: i32, %arg1: i32, %arg2: i32, %arg3: memref<1x8x32xf32, #tpu.memory_space<vmem>>, %arg4: memref<1x32xf32, #tpu.memory_space<vmem>>, %arg5: memref<8x8xf32, #tpu.memory_space<vmem>>, %arg6: memref<8x8xf32, #tpu.memory_space<vmem>>, %arg7: memref<32x32xbf16, #tpu.memory_space<vmem>>, %arg8: memref<32x16xbf16, #tpu.memory_space<vmem>>, %arg9: memref<32x16xbf16, #tpu.memory_space<vmem>>, %arg10: memref<1x4x8x8xbf16, #tpu.memory_space<vmem>>, %arg11: memref<1x2x8x8xbf16, #tpu.memory_space<vmem>>, %arg12: memref<1x2x8x8xbf16, #tpu.memory_space<vmem>>, %arg13: memref<8x32xbf16, #tpu.memory_space<vmem>>) attributes {dimension_semantics = [#tpu.dimension_semantics<parallel>, #tpu.dimension_semantics<parallel>, #tpu.dimension_semantics<arbitrary>], iteration_bounds = array<i64: 2, 1, 1>, scalar_prefetch = 0 : i64, scratch_operands = 1 : i64, tpu.core_type = #tpu.core_type<tc>, window_params = [{transform_indices = @transform_0, window_bounds = array<i64: 1, 8, 32>}, {pipeline_mode = #tpu.pipeline_mode<synchronous>, transform_indices = @transform_1, window_bounds = array<i64: 1, 32>}, {transform_indices = @transform_2, window_bounds = array<i64: 8, 8>}, {transform_indices = @transform_3, window_bounds = array<i64: 8, 8>}, {transform_indices = @transform_4, window_bounds = array<i64: 32, 32>}, {transform_indices = @transform_5, window_bounds = array<i64: 32, 16>}, {transform_indices = @transform_6, window_bounds = array<i64: 32, 16>}, {transform_indices = @transform_7, window_bounds = array<i64: 1, 4, 8, 8>}, {transform_indices = @transform_8, window_bounds = array<i64: 1, 2, 8, 8>}, {transform_indices = @transform_9, window_bounds = array<i64: 1, 2, 8, 8>}]} {
    %c0_i32 = arith.constant 0 : i32
    %0 = arith.cmpi eq, %arg2, %c0_i32 : i32
    %1 = arith.extui %0 : i1 to i32
    %c0_i32_0 = arith.constant 0 : i32
    %2 = arith.cmpi ne, %1, %c0_i32_0 : i32
    scf.if %2 {
      %c0_26 = arith.constant 0 : index
      %c0_27 = arith.constant 0 : index
      %c0_28 = arith.constant 0 : index
      %48 = vector.load %arg3[%c0_26, %c0_27, %c0_28] : memref<1x8x32xf32, #tpu.memory_space<vmem>>, vector<1x8x32xf32>
      %49 = vector.shape_cast %48 : vector<1x8x32xf32> to vector<8x32xf32>
      %c0_29 = arith.constant 0 : index
      %c0_30 = arith.constant 0 : index
      %50 = vector.load %arg4[%c0_29, %c0_30] : memref<1x32xf32, #tpu.memory_space<vmem>>, vector<1x32xf32>
      %51 = arith.mulf %49, %49 : vector<8x32xf32>
      %cst_31 = arith.constant dense<0.000000e+00> : vector<8xf32>
      %52 = vector.multi_reduction <add>, %51, %cst_31 [1] : vector<8x32xf32> to vector<8xf32>
      %53 = vector.shape_cast %52 : vector<8xf32> to vector<8x1xf32>
      %cst_32 = arith.constant 3.200000e+01 : f32
      %54 = vector.broadcast %cst_32 : f32 to vector<8x1xf32>
      %55 = arith.divf %53, %54 : vector<8x1xf32>
      %cst_33 = arith.constant 9.99999997E-7 : f32
      %56 = vector.broadcast %cst_33 : f32 to vector<8x1xf32>
      %57 = arith.addf %55, %56 : vector<8x1xf32>
      %58 = math.rsqrt %57 : vector<8x1xf32>
      %59 = vector.broadcast %58 : vector<8x1xf32> to vector<8x32xf32>
      %60 = arith.mulf %49, %59 : vector<8x32xf32>
      %61 = vector.broadcast %50 : vector<1x32xf32> to vector<8x32xf32>
      %62 = arith.mulf %60, %61 : vector<8x32xf32>
      %63 = arith.truncf %62 : vector<8x32xf32> to vector<8x32xbf16>
      %c0_34 = arith.constant 0 : index
      %c0_35 = arith.constant 0 : index
      %64 = vector.load %arg13[%c0_34, %c0_35] : memref<8x32xbf16, #tpu.memory_space<vmem>>, vector<8x32xbf16>
      tpu.vector_store %arg13[%c0_34, %c0_35], %63 {strides = array<i32>} : memref<8x32xbf16, #tpu.memory_space<vmem>>, vector<8x32xbf16>,
    } else {
    }
    %c0 = arith.constant 0 : index
    %c0_1 = arith.constant 0 : index
    %3 = vector.load %arg13[%c0, %c0_1] : memref<8x32xbf16, #tpu.memory_space<vmem>>, vector<8x32xbf16>
    %c0_2 = arith.constant 0 : index
    %c0_3 = arith.constant 0 : index
    %4 = vector.load %arg5[%c0_2, %c0_3] : memref<8x8xf32, #tpu.memory_space<vmem>>, vector<8x8xf32>
    %5 = vector.shape_cast %4 : vector<8x8xf32> to vector<8x1x8xf32>
    %c0_4 = arith.constant 0 : index
    %c0_5 = arith.constant 0 : index
    %6 = vector.load %arg6[%c0_4, %c0_5] : memref<8x8xf32, #tpu.memory_space<vmem>>, vector<8x8xf32>
    %7 = vector.shape_cast %6 : vector<8x8xf32> to vector<8x1x8xf32>
    %c0_6 = arith.constant 0 : index
    %c0_7 = arith.constant 0 : index
    %8 = vector.load %arg7[%c0_6, %c0_7] : memref<32x32xbf16, #tpu.memory_space<vmem>>, vector<32x32xbf16>
    %cst = arith.constant dense<0.000000e+00> : vector<8x32xf32>
    %9 = tpu.matmul %3, %8, %cst {dimension_numbers = #tpu.dot_dimension_numbers<[1], [0], [0], [1], [0, 0, 1, 1], [], []>} : vector<8x32xbf16>, vector<32x32xbf16>, vector<8x32xf32> -> vector<8x32xf32>
    %10 = vector.shape_cast %9 : vector<8x32xf32> to vector<8x4x8xf32>
    %11 = vector.extract_strided_slice %10 {offsets = [0, 0, 4], sizes = [8, 4, 4], strides = [1, 1, 1]} : vector<8x4x8xf32> to vector<8x4x4xf32>
    %12 = vector.extract_strided_slice %10 {offsets = [0, 0, 0], sizes = [8, 4, 4], strides = [1, 1, 1]} : vector<8x4x8xf32> to vector<8x4x4xf32>
    %13 = tpu.concatenate %11, %12 in 2 : vector<8x4x4xf32>, vector<8x4x4xf32> -> vector<8x4x8xf32>
    %14 = vector.broadcast %5 : vector<8x1x8xf32> to vector<8x4x8xf32>
    %15 = arith.mulf %10, %14 : vector<8x4x8xf32>
    %16 = vector.broadcast %7 : vector<8x1x8xf32> to vector<8x4x8xf32>
    %17 = arith.mulf %13, %16 : vector<8x4x8xf32>
    %18 = arith.addf %15, %17 : vector<8x4x8xf32>
    %19 = tpu.transpose %18, [1, 0, 2] : vector<8x4x8xf32> -> vector<4x8x8xf32>
    %20 = arith.truncf %19 : vector<4x8x8xf32> to vector<4x8x8xbf16>
    %c0_8 = arith.constant 0 : index
    %c0_9 = arith.constant 0 : index
    %c0_10 = arith.constant 0 : index
    %c0_11 = arith.constant 0 : index
    %21 = vector.load %arg10[%c0_8, %c0_9, %c0_10, %c0_11] : memref<1x4x8x8xbf16, #tpu.memory_space<vmem>>, vector<1x4x8x8xbf16>
    %22 = vector.shape_cast %21 : vector<1x4x8x8xbf16> to vector<4x8x8xbf16>
    %23 = vector.shape_cast %20 : vector<4x8x8xbf16> to vector<1x4x8x8xbf16>
    tpu.vector_store %arg10[%c0_8, %c0_9, %c0_10, %c0_11], %23 {strides = array<i32>} : memref<1x4x8x8xbf16, #tpu.memory_space<vmem>>, vector<1x4x8x8xbf16>,
    %c0_12 = arith.constant 0 : index
    %c0_13 = arith.constant 0 : index
    %24 = vector.load %arg8[%c0_12, %c0_13] : memref<32x16xbf16, #tpu.memory_space<vmem>>, vector<32x16xbf16>
    %cst_14 = arith.constant dense<0.000000e+00> : vector<8x16xf32>
    %25 = tpu.matmul %3, %24, %cst_14 {dimension_numbers = #tpu.dot_dimension_numbers<[1], [0], [0], [1], [0, 0, 1, 1], [], []>} : vector<8x32xbf16>, vector<32x16xbf16>, vector<8x16xf32> -> vector<8x16xf32>
    %26 = vector.shape_cast %25 : vector<8x16xf32> to vector<8x2x8xf32>
    %27 = vector.extract_strided_slice %26 {offsets = [0, 0, 4], sizes = [8, 2, 4], strides = [1, 1, 1]} : vector<8x2x8xf32> to vector<8x2x4xf32>
    %28 = vector.extract_strided_slice %26 {offsets = [0, 0, 0], sizes = [8, 2, 4], strides = [1, 1, 1]} : vector<8x2x8xf32> to vector<8x2x4xf32>
    %29 = tpu.concatenate %27, %28 in 2 : vector<8x2x4xf32>, vector<8x2x4xf32> -> vector<8x2x8xf32>
    %30 = vector.broadcast %5 : vector<8x1x8xf32> to vector<8x2x8xf32>
    %31 = arith.mulf %26, %30 : vector<8x2x8xf32>
    %32 = vector.broadcast %7 : vector<8x1x8xf32> to vector<8x2x8xf32>
    %33 = arith.mulf %29, %32 : vector<8x2x8xf32>
    %34 = arith.addf %31, %33 : vector<8x2x8xf32>
    %35 = tpu.transpose %34, [1, 0, 2] : vector<8x2x8xf32> -> vector<2x8x8xf32>
    %36 = arith.truncf %35 : vector<2x8x8xf32> to vector<2x8x8xbf16>
    %c0_15 = arith.constant 0 : index
    %c0_16 = arith.constant 0 : index
    %c0_17 = arith.constant 0 : index
    %c0_18 = arith.constant 0 : index
    %37 = vector.load %arg11[%c0_15, %c0_16, %c0_17, %c0_18] : memref<1x2x8x8xbf16, #tpu.memory_space<vmem>>, vector<1x2x8x8xbf16>
    %38 = vector.shape_cast %37 : vector<1x2x8x8xbf16> to vector<2x8x8xbf16>
    %39 = vector.shape_cast %36 : vector<2x8x8xbf16> to vector<1x2x8x8xbf16>
    tpu.vector_store %arg11[%c0_15, %c0_16, %c0_17, %c0_18], %39 {strides = array<i32>} : memref<1x2x8x8xbf16, #tpu.memory_space<vmem>>, vector<1x2x8x8xbf16>,
    %c0_19 = arith.constant 0 : index
    %c0_20 = arith.constant 0 : index
    %40 = vector.load %arg9[%c0_19, %c0_20] : memref<32x16xbf16, #tpu.memory_space<vmem>>, vector<32x16xbf16>
    %cst_21 = arith.constant dense<0.000000e+00> : vector<8x16xf32>
    %41 = tpu.matmul %3, %40, %cst_21 {dimension_numbers = #tpu.dot_dimension_numbers<[1], [0], [0], [1], [0, 0, 1, 1], [], []>} : vector<8x32xbf16>, vector<32x16xbf16>, vector<8x16xf32> -> vector<8x16xf32>
    %42 = vector.shape_cast %41 : vector<8x16xf32> to vector<8x2x8xf32>
    %43 = tpu.transpose %42, [1, 0, 2] : vector<8x2x8xf32> -> vector<2x8x8xf32>
    %44 = arith.truncf %43 : vector<2x8x8xf32> to vector<2x8x8xbf16>
    %c0_22 = arith.constant 0 : index
    %c0_23 = arith.constant 0 : index
    %c0_24 = arith.constant 0 : index
    %c0_25 = arith.constant 0 : index
    %45 = vector.load %arg12[%c0_22, %c0_23, %c0_24, %c0_25] : memref<1x2x8x8xbf16, #tpu.memory_space<vmem>>, vector<1x2x8x8xbf16>
    %46 = vector.shape_cast %45 : vector<1x2x8x8xbf16> to vector<2x8x8xbf16>
    %47 = vector.shape_cast %44 : vector<2x8x8xbf16> to vector<1x2x8x8xbf16>
    tpu.vector_store %arg12[%c0_22, %c0_23, %c0_24, %c0_25], %47 {strides = array<i32>} : memref<1x2x8x8xbf16, #tpu.memory_space<vmem>>, vector<1x2x8x8xbf16>,
    return
  }
  func.func @transform_0(%arg0: i32, %arg1: i32, %arg2: i32) -> (i32, i32, i32) {
    %c0_i32 = arith.constant 0 : i32
    %c0_i32_0 = arith.constant 0 : i32
    return %arg0, %arg1, %c0_i32 : i32, i32, i32
  }
  func.func @transform_1(%arg0: i32, %arg1: i32, %arg2: i32) -> (i32, i32) {
    %c0_i32 = arith.constant 0 : i32
    %c0_i32_0 = arith.constant 0 : i32
    %c0_i32_1 = arith.constant 0 : i32
    return %c0_i32, %c0_i32_0 : i32, i32
  }
  func.func @transform_2(%arg0: i32, %arg1: i32, %arg2: i32) -> (i32, i32) {
    %c0_i32 = arith.constant 0 : i32
    %c0_i32_0 = arith.constant 0 : i32
    return %arg1, %c0_i32 : i32, i32
  }
  func.func @transform_3(%arg0: i32, %arg1: i32, %arg2: i32) -> (i32, i32) {
    %c0_i32 = arith.constant 0 : i32
    %c0_i32_0 = arith.constant 0 : i32
    return %arg1, %c0_i32 : i32, i32
  }
  func.func @transform_4(%arg0: i32, %arg1: i32, %arg2: i32) -> (i32, i32) {
    %c0_i32 = arith.constant 0 : i32
    %c0_i32_0 = arith.constant 0 : i32
    return %c0_i32, %arg2 : i32, i32
  }
  func.func @transform_5(%arg0: i32, %arg1: i32, %arg2: i32) -> (i32, i32) {
    %c0_i32 = arith.constant 0 : i32
    %c0_i32_0 = arith.constant 0 : i32
    return %c0_i32, %arg2 : i32, i32
  }
  func.func @transform_6(%arg0: i32, %arg1: i32, %arg2: i32) -> (i32, i32) {
    %c0_i32 = arith.constant 0 : i32
    %c0_i32_0 = arith.constant 0 : i32
    return %c0_i32, %arg2 : i32, i32
  }
  func.func @transform_7(%arg0: i32, %arg1: i32, %arg2: i32) -> (i32, i32, i32, i32) {
    %c0_i32 = arith.constant 0 : i32
    %c0_i32_0 = arith.constant 0 : i32
    return %arg0, %arg2, %arg1, %c0_i32 : i32, i32, i32, i32
  }
  func.func @transform_8(%arg0: i32, %arg1: i32, %arg2: i32) -> (i32, i32, i32, i32) {
    %c0_i32 = arith.constant 0 : i32
    %c0_i32_0 = arith.constant 0 : i32
    return %arg0, %arg2, %arg1, %c0_i32 : i32, i32, i32, i32
  }
  func.func @transform_9(%arg0: i32, %arg1: i32, %arg2: i32) -> (i32, i32, i32, i32) {
    %c0_i32 = arith.constant 0 : i32
    %c0_i32_0 = arith.constant 0 : i32
    return %arg0, %arg2, %arg1, %c0_i32 : i32, i32, i32, i32
  }
}

</mosaic_0001>

<bundles_post_ra>
// kernel: tpu_custom_call.1
= control target key start
LH: loop header
LB: loop body
LE: loop exit
PB: predicated region body
PF: predicated region fallthrough
CT: control target
= control target key end

     0   :  { %s2469_s0 = inlined_call_operand.vmem [shape: f32[2,8,32], index: 0, kind: input, shape index: {}]   ;;  %s2470_s1 = inlined_call_operand.hbm [shape: f32[1,32], index: 1, kind: input, shape index: {}]   ;;  %s2471_s2 = inlined_call_operand.vmem [shape: f32[8,8], index: 2, kind: input, shape index: {}]   ;;  %s2472_s3 = inlined_call_operand.hbm [shape: f32[8,8], index: 3, kind: input, shape index: {}]   ;;  %s2473_s4 = inlined_call_operand.vmem [shape: bf16[32,32], index: 4, kind: input, shape index: {}]   ;;  %s2474_s5 = inlined_call_operand.vmem [shape: bf16[32,16], index: 5, kind: input, shape index: {}]   ;;  %s2475_s6 = inlined_call_operand.vmem [shape: bf16[32,16], index: 6, kind: input, shape index: {}]   ;;  %s2476_s7 = inlined_call_operand.hbm [shape: bf16[2,4,8,8], index: 7, kind: output, shape index: {0}]   ;;  %s2477_s8 = inlined_call_operand.hbm [shape: bf16[2,2,8,8], index: 8, kind: output, shape index: {1}]   ;;  %s2478_s9 = inlined_call_operand.hbm [shape: bf16[2,2,8,8], index: 9, kind: output, shape index: {2}]  }
   0x1   :  { %2486 = sst [smem:[#allocation17_spill]] %s2469_s0 }
   0x2   :  { %2487 = sst [smem:[#allocation18_spill]] %s2470_s1 }
   0x3   :  { %2488 = sst [smem:[#allocation19_spill]] %s2471_s2 }
   0x4   :  { %2489 = sst [smem:[#allocation20_spill]] %s2472_s3 }
   0x5   :  { %15 = vsyncpa [#allocation4], 0 }
   0x6   :  { %16 = vsyncpa [#allocation7], 0 }
   0x7   :  { %17 = vsyncpa [#allocation5], 0 }
   0x8   :  { %19 = vsyncpa [#allocation5 + $0x1], 0 }
   0x9   :  { %20 = vsyncpa [#allocation10], 0 }
   0xa   :  { %22 = vsyncpa [#allocation10 + $0x1], 0  ;;  %s1921_s30 = smov 0   ;;  %s1923_s10 = smov 0  }
   0xb   :  { %s1925_s11 = smov 0   ;;  %s1927_s12 = smov 0  }
   0xc   :  { %s1929_s13 = smov 0   ;;  %s1931_s14 = smov 0  }
   0xd LB: > { %s1952_s15 = sadd.s32 4294967295, %s1858_s14   ;;  %s2479_s16 = sadd.s32 4294967294, %s1858_s14   ;;  %s1858_s14 = sphi %s1931_s14, %s28_s14   ;;  %s1854_s13 = sphi %s1929_s13, %s2507_s13   ;;  %s1850_s12 = sphi %s1927_s12, %s2506_s12   ;;  %s1846_s11 = sphi %s1925_s11, %s2505_s11   ;;  %s1842_s10 = sphi %s1923_s10, %s2504_s10   ;;  %s1838_s30 = sphi %s1921_s30, %s2503_s30  }
   0xe   : > { %s47_s17 = sadd.s32 1, %s1854_s13  ;;  %s237_s18 = sadd.s32 1, %s1846_s11 }
   0xf   : > { %p49_p0 = scmp.ge.s32.totalorder %s47_s17, 2  ;;  %p247_p1 = scmp.ne.s32.totalorder %s1846_s11, %s1842_s10 }
  0x10   : > { %p248_p2 = scmp.eq.s32.totalorder %s1952_s15, 1  ;;  %p253_p3 = scmp.ne.s32.totalorder %s1842_s10, %s1838_s30 }
  0x11   : > { %s2509_s17 = smov (%p49_p0, %s47_s17), 0  ;;  %p254_p5 = scmp.eq.s32.totalorder %s2479_s16, 1 }
  0x12   : > { %2490 = sst [smem:[#allocation16_spill]] %s2509_s17  ;;  %p1964_p4 = por %p248_p2, %p247_p1 }
  0x13   : > { %s230_s20 = ssub.s32 %s1854_s13, %s2509_s17  ;;  %p1490_p6 = scmp.ge.s32.totalorder %s1858_s14, 1 }
  0x14   : > { %p235_p7 = scmp.eq.s32.totalorder %s230_s20, 0  ;;  %p1973_p8 = por %p254_p5, %p253_p3 }
  0x15   : > { %p321_p9 = scmp.lt.s32.totalorder %s1858_s14, 3  ;;  %p1583_p11 = scmp.eq.s32.totalorder %s1952_s15, 0 }
  0x16   : > { %s1979_s22 = scalar_select %p235_p7, %s1846_s11, %s237_s18  }
  0x17   : > { %p1981_p10 = pnand %p1490_p6, %p321_p9  ;;  %s2494_s1 = sld [smem:[#allocation18_spill]] }
  0x18   : > { %s1860_s27 = smov [#allocation3]   ;;  %s2495_s3 = sld [smem:[#allocation20_spill]] }
  0x19   : > { %p1566_p12 = pneg %p1981_p10  ;;  %s335_s28 = sshll.u32 %s1860_s27, 4  ;;  %s336_s28 = int_to_ptr.vmem [resolvable:$true] %s335_s28 }
  0x1a   : > { %s1861_s16 = smov [#allocation6]  }
  0x1b   : > { %p1567_p13 = pnand %p1583_p11, %p1566_p12  ;;  %s356_s17 = sshll.u32 %s1861_s16, 4  ;;  %s357_s17 = int_to_ptr.vmem [resolvable:$true] %s356_s17 }
  0x1c   : > { %400 = sbr.rel (%p1981_p10) target bundleno = 686 (0x2ae), region = 48 }
  0x1d   : > { %s333_s26 = sshll.u32 %s2494_s1, 4  ;;  %s334_s26 = int_to_ptr.hbm [resolvable:$true] %s333_s26 }
  0x1e   : > { %s354_s18 = sshll.u32 %s2495_s3, 4  ;;  %s355_s18 = int_to_ptr.hbm [resolvable:$true] %s354_s18 }
  0x1f   : > { %1569 = dma.hbm_to_vmem [thread:$0]  (!%p1567_p13), %s334_s26, 16, %s336_s28, [#allocation4]  }
  0x20   : > { %1572 = dma.hbm_to_vmem [thread:$0]  (!%p1567_p13), %s355_s18, 128, %s357_s17, [#allocation7]  }
  0x21   : > { %1821 = dma.done.wait (%p1583_p11), [#allocation4], 16  }
  0x22   : > { %1823 = vsyncadd (%p1583_p11), [#allocation4], 4294967280 }
  0x23   : > { %1825 = dma.done.wait (%p1583_p11), [#allocation7], 128  }
  0x24   : > { %1827 = vsyncadd (%p1583_p11), [#allocation7], 4294967168  ;;  %p470_p0 = scmp.lt.s32.totalorder %s1850_s12, 1  ;;  %s2496_s0 = sld [smem:[#allocation17_spill]]  ;;  %vm504_vm0 = vcmask 261120   ;;  %v1862_v3 = vmov 32.0  }
  0x25   : > { %1648 = vrcp.f32 %v1862_v3  ;;  %v1544_v9 = vld [vmem:[%s2473_s4 + $0x8] sm:$0xff]  ;;  %v1543_v13 = vld [vmem:[%s2473_s4] sm:$0xff]  ;;  %vm533_vm5 = vcmask 257024   ;;  %s1863_s27 = smov 104   ;;  %s1864_s28 = smov 112   ;;  %vm598_vm6 = vcmask 1047556  }
  0x26   : > { %s471_s16 = scalar_select %p470_p0, %s1850_s12, 1  ;;  %v1546_v10 = vld [vmem:[%s2474_s5 + $0x8] sm:$0xff]  ;;  %580 = vmatpush.bf16.msra.mxu0 %v1544_v9  ;;  %v1545_v14 = vld [vmem:[%s2474_s5] sm:$0xff]  ;;  %v1866_v37 = vmov 1983009808   ;;  %vm835_vm7 = vcmask 60416  }
  0x27   : > { %v1548_v11 = vld [vmem:[%s2475_s6 + $0x8] sm:$0xff]  ;;  %862 = vmatpush.bf16.msra.mxu1 %v1546_v10  ;;  %v1547_v15 = vld [vmem:[%s2475_s6] sm:$0xff]  ;;  %s1865_s29 = smov 120   ;;  %v603_v38 = vunpack.c.l.s4 %v1866_v37  ;;  %v1867_v52 = vmov 1934713408   ;;  %s2482_s20 = smov 4  }
  0x28   : > { %s1504_s17 = sshll.u32 %s471_s16, 3  ;;  %1079 = vmatpush.bf16.msra.mxu2 %v1548_v11  ;;  %v1647_v25 = vld [vmem:[#allocation3] ss:$0 sm:$0xff]  ;;  %v627_v53 = vunpack.c.l.s4 %v1867_v52  ;;  %s1869_s18 = smov 124   ;;  %vm710_vm8 = vcmask 31744  }
  0x29   : > { %v2038_v40 = vunpack.c.0.s8 %v603_v38  ;;  %s2132_s16 = sand.u32 1, %s1842_s10   ;;  %s2497_s2 = sld [smem:[#allocation19_spill]] }
  0x2a   : > { %s476_s25 = scalar_lea.vmem %s2496_s0, %s1504_s17  ;;  %581 = vmatpush.bf16.msra.mxu0 %v1543_v13  ;;  %s2481_s17 = sshll.u32 %s2132_s16, 3 }
  0x2b   : > { %v501_v0 = vld [vmem:[%s476_s25] sm:$0xff]  ;;  %v1649_v4 = vpop.eup %1648  ;;  %863 = vmatpush.bf16.msra.mxu1 %v1545_v14  ;;  %s2157_s24 = scalar_lea.vmem [#allocation11], %s2481_s17  ;;  %s1549_s26 = sshll.u32 %s1850_s12, 4 }
  0x2c   : > { %v503_v1 = vmul.f32 %v501_v0, %v501_v0  ;;  %v509_v5 = vmul.f32 32.0, %v1649_v4  ;;  %vm513_vm1 = vweird.f32 %v1649_v4  ;;  %1080 = vmatpush.bf16.msra.mxu2 %v1547_v15  ;;  %s1732_s0 = scalar_lea.hbm %s2476_s7, 32 }
  0x2e   : > { %v505_v2 = vsel %vm504_vm0, %v503_v1, 0.0  ;;  %v510_v6 = vsub.f32 1.0, %v509_v5  ;;  %v2058_v1 = vunpack.c.0.s8 %v627_v53 }
  0x2f   : > { %506 = vadd.xlane.f32.xlu0 %v505_v2 }
  0x30   : > { %v511_v7 = vmul.f32 %v1649_v4, %v510_v6 }
  0x32   : > { %v512_v8 = vadd.f32 %v1649_v4, %v511_v7 }
  0x34   : > { %v514_v12 = vsel %vm513_vm1, %v1649_v4, %v512_v8 }
  0xa2   : > { %v507_v16 = vpop.xlane.xlu0 %506 }
  0xa3   : > { %v515_v17 = vmul.f32 %v514_v12, %v507_v16 }
  0xa5   : > { %v516_v18 = vadd.f32 1e-06, %v515_v17 }
  0xa7   : > { %1650 = vrsqrt.f32 %v516_v18  ;;  %vm523_vm3 = vweird.f32 %v516_v18 }
  0xad   : > { %v1651_v19 = vpop.eup %1650 }
  0xae   : > { %v518_v20 = vmul.f32 %v1651_v19, %v516_v18  ;;  %vm524_vm2 = vweird.f32 %v1651_v19 }
  0xaf   : > { %vm525_vm4 = vmor %vm523_vm3, %vm524_vm2 }
  0xb0   : > { %v519_v21 = vmul.f32 %v1651_v19, %v518_v20 }
  0xb2   : > { %v520_v22 = vmul.f32 0.5, %v519_v21 }
  0xb4   : > { %v521_v23 = vsub.f32 1.5, %v520_v22 }
  0xb6   : > { %v522_v24 = vmul.f32 %v1651_v19, %v521_v23 }
  0xb8   : > { %v526_v26 = vsel %vm525_vm4, %v1651_v19, %v522_v24 }
  0xb9   : > { %v527_v27 = vmul.f32 %v526_v26, %v501_v0 }
  0xbb   : > { %v531_v28 = vmul.f32 %v1647_v25, %v527_v27 }
  0xbd   : > { %v532_v29 = vpack.c.bf16 %v531_v28, %v531_v28 }
  0xbf   : > { %534 = vst.msk [vmem:[#allocation2] sm:$0xf] %vm533_vm5, %v532_v29 }
  0xc6   : > { %v535_v30 = vld [vmem:[#allocation2] sm:$0xf] }
  0xc7   : > { %1513 = vmatmul.msk.bf16.vlgmr.msra.gmra.mxu0 %vm504_vm0, %v535_v30  ;;  %1522 = vmatmul.msk.bf16.vlgmr.msra.gmra.mxu1 %vm504_vm0, %v535_v30 }
  0xc8   : > { %1531 = vmatmul.msk.bf16.vlgmr.msra.gmra.mxu2 %vm504_vm0, %v535_v30 }
 0x144   : > { %v2033_v31 = vpop.f32.mrf.mxu0  ;;  %v865_v32 = vpop.f32.mrf.mxu1 }
 0x145   : > { %594 = vrot.lane.b32.xlu2 %v2033_v31, %s1863_s27  ;;  %591 = vrot.lane.b32.xlu1 %v2033_v31, %s1864_s28  ;;  %v873_v43 = vrot.slane %v865_v32, 4  ;;  %v600_v44 = vrot.slane %v2033_v31, 4  ;;  %v878_v46 = vperm.slane %v865_v32, %v2038_v40  ;;  %s1501_s27 = sshll.u32 %s2132_s16, 4 }
 0x146   : > { %588 = vrot.lane.b32.xlu0 %v2033_v31, %s1865_s29  ;;  %s455_s23 = scalar_lea.vmem [#allocation8], %s1501_s27  ;;  %s1185_s27 = scalar_lea.sflag [#allocation5], %s2132_s16 }
 0x147   : > { %v874_v50 = vsel %vm598_vm6, 0.0, %v873_v43  ;;  %v895_v56 = vrot.slane %v878_v46, 4  ;;  %s1210_s25 = sshll.u32 %s455_s23, 4  ;;  %s1211_s25 = int_to_ptr.vmem [resolvable:$true] %s1210_s25 }
 0x148   : > { %v2055_v59 = vperm.slane %v874_v50, %v2038_v40 }
 0x14a   : > { %v907_v28 = vrot.slane %v2055_v59, 4 }
 0x14b   : > { %v1082_v33 = vpop.f32.mrf.mxu2 }
 0x14c   : > { %v585_v34 = vpop.f32.mrf.mxu0  ;;  %v867_v35 = vpop.f32.mrf.mxu1  ;;  %v1090_v39 = vrot.slane %v1082_v33, 4  ;;  %v1095_v49 = vperm.slane %v1082_v33, %v2038_v40 }
 0x14d   : > { %870 = vrot.lane.b32.xlu1 %v865_v32, %s1865_s29 }
 0x14e   : > { %1087 = vrot.lane.b32.xlu0 %v1082_v33, %s1865_s29  ;;  %v1091_v45 = vsel %vm598_vm6, 0.0, %v1090_v39  ;;  %v1112_v60 = vrot.slane %v1095_v49, 4 }
 0x14f   : > { %v1099_v51 = vperm.slane %v1091_v45, %v2038_v40 }
 0x151   : > { %v1124_v0 = vrot.slane %v1099_v51, 4 }
 0x153   : > { %v1084_v36 = vpop.f32.mrf.mxu2 }
 0x19f   : > { %v595_v54 = vpop.permute.xlu2 %594 }
 0x1a0   : > { %v610_v4 = vrot.slane %v595_v54, 4 }
 0x1b7   : > { %v2040_v41 = vpop.permute.xlu1 %591 }
 0x1b8   : > { %v589_v42 = vpop.permute.xlu0 %588  ;;  %v601_v47 = vsel %vm598_vm6, %v2040_v41, %v600_v44  ;;  %v597_v8 = vrot.slane %v2040_v41, 4 }
 0x1b9   : > { %v612_v48 = vrot.slane %v589_v42, 4  ;;  %v2051_v55 = vperm.slane %v601_v47, %v2038_v40  ;;  %v611_v16 = vsel %vm598_vm6, %v610_v4, %v589_v42 }
 0x1ba   : > { %v599_v33 = vsel %vm598_vm6, %v597_v8, %v2033_v31  ;;  %v617_v37 = vperm.slane %v611_v16, %v2038_v40 }
 0x1bb   : > { %v613_v57 = vsel %vm598_vm6, %v595_v54, %v612_v48  ;;  %v636_v5 = vrot.slane %v2051_v55, 4  ;;  %v605_v50 = vperm.slane %v599_v33, %v2038_v40 }
 0x1bc   : > { %v2063_v6 = vperm.slane %v613_v57, %v2038_v40  ;;  %v622_v54 = vrot.slane %v617_v37, 4 }
 0x1be   : > { %v637_v23 = vsel %vm598_vm6, %v2063_v6, %v636_v5 }
 0x1bf   : > { %v871_v58 = vpop.permute.xlu1 %870  ;;  %v2105_v41 = vperm.slane %v637_v23, %v2058_v1 }
 0x1c0   : > { %v883_v61 = vrot.slane %v871_v58, 4  ;;  %v888_v62 = vperm.slane %v871_v58, %v2038_v40  ;;  %v1088_v63 = vpop.permute.xlu0 %1087 }
 0x1c1   : > { %v1100_v2 = vrot.slane %v1088_v63, 4  ;;  %v1105_v3 = vperm.slane %v1088_v63, %v2038_v40 }
 0x1c2   : > { %v896_v7 = vsel %vm598_vm6, %v888_v62, %v895_v56  ;;  %v884_v12 = vsel %vm598_vm6, 0.0, %v883_v61  ;;  %v893_v13 = vrot.slane %v888_v62, 4 }
 0x1c3   : > { %v2068_v9 = vperm.slane %v896_v7, %v2058_v1  ;;  %v1101_v10 = vsel %vm598_vm6, 0.0, %v1100_v2  ;;  %v1110_v11 = vrot.slane %v1105_v3, 4  ;;  %v1113_v15 = vsel %vm598_vm6, %v1105_v3, %v1112_v60 }
 0x1c4   : > { %v1109_v14 = vperm.slane %v1101_v10, %v2038_v40  ;;  %v1121_v18 = vperm.slane %v1113_v15, %v2058_v1  ;;  %v2087_v24 = vperm.slane %v884_v12, %v2038_v40  ;;  %v894_v29 = vsel %vm598_vm6, %v893_v13, %v878_v46 }
 0x1c5   : > { %v1111_v17 = vsel %vm598_vm6, %v1110_v11, %v1095_v49  ;;  %961 = vrot.lane.b32.xlu1 %v2068_v9, %s2482_s20  ;;  %937 = vrot.lane.b32.xlu0 %v2068_v9, %s1869_s18  ;;  %v919_v19 = vrot.slane %v2068_v9, 4  ;;  %v2109_v44 = vperm.slane %v894_v29, %v2058_v1  ;;  %v623_v2 = vsel %vm598_vm6, %v622_v54, %v605_v50 }
 0x1c6   : > { %v1117_v20 = vperm.slane %v1111_v17, %v2058_v1  ;;  %v1122_v21 = vrot.slane %v1109_v14, 4  ;;  %v1125_v22 = vsel %vm598_vm6, %v1109_v14, %v1124_v0  ;;  %v1136_v26 = vrot.slane %v1121_v18, 4 }
 0x1c7   : > { %v1133_v25 = vperm.slane %v1125_v22, %v2058_v1  ;;  %v2091_v27 = vsel %vm598_vm6, 0.0, %v919_v19  ;;  %v908_v31 = vsel %vm598_vm6, %v2087_v24, %v907_v28  ;;  %v634_v3 = vrot.slane %v2063_v6, 4 }
 0x1c8   : > { %v1123_v30 = vsel %vm598_vm6, %v1122_v21, %v1099_v51  ;;  %v1134_v32 = vrot.slane %v1117_v20, 4  ;;  %939 = vrot.lane.b32.xlu2 %v2091_v27, %s1869_s18  ;;  %v1137_v35 = vsel %vm598_vm6, 0.0, %v1136_v26  ;;  %v1142_v45 = vsel %vm598_vm6, %v1136_v26, %v1117_v20 }
 0x1c9   : > { %v1129_v34 = vperm.slane %v1123_v30, %v2058_v1  ;;  %v1140_v36 = vrot.slane %v1133_v25, 4  ;;  %v1147_v39 = vrot.slane %v1137_v35, 4  ;;  %v2125_v53 = vperm.slane %v908_v31, %v2058_v1 }
 0x1ca   : > { %v1135_v38 = vsel %vm598_vm6, 0.0, %v1134_v32  ;;  %v1146_v56 = vperm.slane %v1142_v45, %v2038_v40  ;;  %v2148_v10 = vperm.slane %v623_v2, %v2058_v1  ;;  %v624_v11 = vrot.slane %v605_v50, 4 }
 0x1cb   : > { %v1138_v42 = vrot.slane %v1129_v34, 4  ;;  %v1141_v43 = vsel %vm598_vm6, 0.0, %v1140_v36  ;;  %v1148_v46 = vsel %vm598_vm6, %v1147_v39, %v1135_v38  ;;  %v1153_v51 = vsel %vm598_vm6, %v1140_v36, %v1129_v34  ;;  %v2256_v39 = vld [vmem:[%s2497_s2] sm:$0xff] }
 0x1cc   : > { %v1158_v47 = vrot.slane %v1141_v43, 4  ;;  %v1152_v49 = vperm.slane %v1148_v46, %v2038_v40  ;;  %v1157_v60 = vperm.slane %v1153_v51, %v2038_v40  ;;  %v635_v13 = vsel %vm598_vm6, %v634_v3, %v2051_v55 }
 0x1cd   : > { %v1139_v48 = vsel %vm598_vm6, 0.0, %v1138_v42  ;;  %933 = vrot.lane.b32.xlu0 %v2109_v44, %s1869_s18  ;;  %674 = vrot.lane.b32.xlu1 %v2105_v41, %s1869_s18  ;;  %v625_v15 = vsel %vm598_vm6, %v617_v37, %v624_v11  ;;  %v2163_v16 = vperm.slane %v635_v13, %v2058_v1  ;;  %v652_v17 = vrot.slane %v2105_v41, 4  ;;  %v2250_v37 = vld [vmem:[#allocation6] sm:$0xff] }
 0x1ce   : > { %v1159_v52 = vsel %vm598_vm6, %v1158_v47, %v1139_v48  ;;  %v1164_v58 = vrot.slane %v1152_v49, 4  ;;  %v2172_v55 = vperm.slane %v625_v15, %v2058_v1  ;;  %v917_v19 = vrot.slane %v2109_v44, 4 }
 0x1cf   : > { %v1163_v57 = vperm.slane %v1159_v52, %v2038_v40  ;;  %v2178_v18 = vsel %vm598_vm6, 0.0, %v652_v17  ;;  %v646_v20 = vrot.slane %v2148_v10, 4  ;;  %v923_v23 = vrot.slane %v2125_v53, 4 }
 0x1d0   : > { %945 = vrot.lane.b32.xlu2 %v2125_v53, %s1869_s18  ;;  %v1165_v61 = vsel %vm598_vm6, %v1164_v58, %v1146_v56  ;;  %v2189_v21 = vsel %vm598_vm6, 0.0, %v917_v19  ;;  %v648_v25 = vrot.slane %v2172_v55, 4  ;;  %v650_v29 = vrot.slane %v2163_v16, 4 }
 0x1d1   : > { %v1170_v62 = vrot.slane %v1163_v57, 4  ;;  %v1169_v63 = vperm.slane %v1165_v61, %v2058_v1  ;;  %v2192_v22 = vsel %vm598_vm6, 0.0, %v646_v20  ;;  %v2203_v26 = vsel %vm598_vm6, 0.0, %v923_v23 }
 0x1d2   : > { %v2206_v28 = vsel %vm598_vm6, 0.0, %v648_v25  ;;  %v905_v30 = vrot.slane %v2087_v24, 4  ;;  %v2217_v32 = vsel %vm598_vm6, 0.0, %v650_v29  ;;  %v548_v38 = vrot.slane %v2250_v37, 2 }
 0x1d3   : > { %v1171_v0 = vsel %vm598_vm6, %v1170_v62, %v1157_v60  ;;  %v1178_v5 = vrot.slane %v1169_v63, 4  ;;  %v539_v43 = vrot.slane %v2256_v39, 2  ;;  %v549_v57 = vrot.slane %v2250_v37, 3 }
 0x1d4   : > { %v1175_v4 = vperm.slane %v1171_v0, %v2058_v1  ;;  %v906_v33 = vsel %vm598_vm6, %v905_v30, %v2055_v59  ;;  %v745_v31 = vperm.slane %v548_v38, 0  ;;  %v540_v60 = vrot.slane %v2256_v39, 3 }
 0x1d5   : > { %698 = vrot.lane.b32.xlu0 %v2105_v41, %s2482_s20  ;;  %963 = vrot.lane.b32.xlu1 %v2091_v27, %s2482_s20  ;;  %v2228_v34 = vperm.slane %v906_v33, %v2058_v1  ;;  %v721_v46 = vperm.slane %v539_v43, 0  ;;  %v552_v61 = vrot.slane %v2250_v37, 6  ;;  %v543_v62 = vrot.slane %v2256_v39, 6 }
 0x1d6   : > { %v1176_v7 = vrot.slane %v1175_v4, 4  ;;  %v1179_v8 = vsel %vm598_vm6, %v1175_v4, %v1178_v5  ;;  %v2271_v0 = vperm.slane %v540_v60, 0 }
 0x1d7   : > { %v1181_v12 = vpack.c.bf16 %v1179_v8, %v1179_v8  ;;  %v921_v24 = vrot.slane %v2228_v34, 4  ;;  %v991_v49 = vmul.f32 %v2068_v9, %v721_v46  ;;  %v749_v9 = vperm.slane %v552_v61, 0 }
 0x1d8   : > { %v1177_v6 = vsel %vm598_vm6, %v1176_v7, %v1169_v63  ;;  %662 = vrot.lane.b32.xlu2 %v2148_v10, %s1869_s18  ;;  %v2269_v63 = vperm.slane %v549_v57, 0  ;;  %v725_v4 = vperm.slane %v543_v62, 0  ;;  %v992_v8 = vmul.f32 %v2091_v27, %v2271_v0 }
 0x1d9   : > { %v1180_v14 = vpack.c.bf16 %v1177_v6, %v1177_v6  ;;  %1183 = vst.msk [vmem:[%s2157_s24 + $0x4] sm:$0xf] %vm835_vm7, %v1181_v12  ;;  %v2238_v35 = vsel %vm598_vm6, 0.0, %v921_v24  ;;  %v541_v12 = vrot.slane %v2256_v39, 4  ;;  %v550_v6 = vrot.slane %v2250_v37, 4 }
 0x1da   : > { %v741_v17 = vmul.f32 %v725_v4, %v2105_v41  ;;  %v995_v24 = vmul.f32 %v2125_v53, %v725_v4  ;;  %v538_v61 = vrot.slane %v2256_v39, 1 }
 0x1db   : > { %1182 = vst.msk [vmem:[%s2157_s24] sm:$0xf] %vm835_vm7, %v1180_v14  ;;  %v2281_v19 = vperm.slane %v541_v12, 0  ;;  %v2283_v20 = vperm.slane %v550_v6, 0 }
 0x1dc   : > { %v720_v4 = vperm.slane %v538_v61, 0 }
 0x1dd   : > { %969 = vrot.lane.b32.xlu0 %v2125_v53, %s2482_s20  ;;  %694 = vrot.lane.b32.xlu1 %v2163_v16, %s2482_s20  ;;  %v739_v38 = vmul.f32 %v2281_v19, %v2163_v16  ;;  %v743_v53 = vperm.slane %v2250_v37, 0 }
 0x1e0   : > { %666 = vrot.lane.b32.xlu2 %v2172_v55, %s1869_s18 }
 0x1e5   : > { %686 = vrot.lane.b32.xlu0 %v2148_v10, %s2482_s20  ;;  %700 = vrot.lane.b32.xlu1 %v2178_v18, %s2482_s20 }
 0x1e8   : > { %670 = vrot.lane.b32.xlu2 %v2163_v16, %s1869_s18 }
 0x1ed   : > { %959 = vrot.lane.b32.xlu0 %v2189_v21, %s2482_s20  ;;  %664 = vrot.lane.b32.xlu1 %v2192_v22, %s1869_s18 }
 0x1f0   : > { %690 = vrot.lane.b32.xlu2 %v2172_v55, %s2482_s20 }
 0x1f5   : > { %947 = vrot.lane.b32.xlu0 %v2203_v26, %s1869_s18  ;;  %668 = vrot.lane.b32.xlu1 %v2206_v28, %s1869_s18 }
 0x1f8   : > { %935 = vrot.lane.b32.xlu2 %v2189_v21, %s1869_s18 }
 0x1fd   : > { %688 = vrot.lane.b32.xlu1 %v2192_v22, %s2482_s20  ;;  %672 = vrot.lane.b32.xlu0 %v2217_v32, %s1869_s18 }
 0x200   : > { %676 = vrot.lane.b32.xlu2 %v2178_v18, %s1869_s18 }
 0x205   : > { %692 = vrot.lane.b32.xlu1 %v2206_v28, %s2482_s20  ;;  %965 = vrot.lane.b32.xlu0 %v2228_v34, %s2482_s20 }
 0x208   : > { %971 = vrot.lane.b32.xlu2 %v2203_v26, %s2482_s20 }
 0x20d   : > { %943 = vrot.lane.b32.xlu1 %v2238_v35, %s1869_s18 }
 0x210   : > { %967 = vrot.lane.b32.xlu2 %v2238_v35, %s2482_s20 }
 0x215   : > { %941 = vrot.lane.b32.xlu1 %v2228_v34, %s1869_s18  ;;  %s1209_s18 = scalar_lea.hbm %s2476_s7, %s1549_s26  ;;  %s1550_s26 = sshll.u32 %s1850_s12, 3 }
 0x216   : > { %s1212_s17 = sshll.u32 %s1209_s18, 4  ;;  %s1213_s17 = int_to_ptr.hbm [resolvable:$true] %s1212_s17 }
 0x217   : > { %s1726_s28 = sshra.s32 %s1213_s17, 4  ;;  %s1727_s28 = int_to_ptr.hbm [resolvable:$true] %s1726_s28 }
 0x218   : > { %696 = vrot.lane.b32.xlu2 %v2217_v32, %s2482_s20  ;;  %s1728_s29 = scalar_lea.hbm %s1727_s28, 16  ;;  %p1733_p5 = scmp.lt.s32.totalorder %s1727_s28, %s2476_s7 }
 0x219   : > { %p1729_p1 = scmp.ne.s32.totalorder %s1727_s28, %s1728_s29  ;;  %p1734_p6 = scmp.lt.s32.totalorder %s1732_s0, %s1728_s29 }
 0x21b   : > { %p1730_p2 = pnand %p1729_p1, %p1964_p4  ;;  %p1735_p7 = por %p1734_p6, %p1733_p5 }
 0x21d   : > { %p1731_p3 = pneg %p1730_p2 }
 0x21f   : > { %p1736_p9 = pnand %p1735_p7, %p1731_p3 }
 0x220   : > { %957 = vrot.lane.b32.xlu2 %v2109_v44, %s2482_s20 }
 0x222   : > { %v940_v59 = vpop.permute.xlu2 %939 }
 0x22a   : > { %v946_v36 = vpop.permute.xlu2 %945 }
 0x232   : > { %v663_v42 = vpop.permute.xlu2 %662 }
 0x237   : > { %v962_v45 = vpop.permute.xlu1 %961  ;;  %v938_v47 = vpop.permute.xlu0 %937 }
 0x238   : > { %v983_v48 = vsel %vm710_vm8, %v938_v47, %v962_v45 }
 0x239   : > { %v999_v50 = vmul.f32 %v983_v48, %v745_v31 }
 0x23a   : > { %v667_v51 = vpop.permute.xlu2 %666 }
 0x23b   : > { %v2261_v52 = vadd.f32 %v999_v50, %v991_v49  ;;  %v737_v50 = vmul.f32 %v721_v46, %v2172_v55  ;;  %v547_v55 = vrot.slane %v2250_v37, 1 }
 0x23f   : > { %v2263_v54 = vpop.permute.xlu0 %933  ;;  %v675_v56 = vpop.permute.xlu1 %674 }
 0x242   : > { %v671_v58 = vpop.permute.xlu2 %670 }
 0x247   : > { %v699_v2 = vpop.permute.xlu0 %698  ;;  %v964_v3 = vpop.permute.xlu1 %963 }
 0x248   : > { %v717_v5 = vsel %vm710_vm8, %v675_v56, %v699_v2  ;;  %v984_v7 = vsel %vm710_vm8, %v940_v59, %v964_v3  ;;  %v744_v3 = vperm.slane %v547_v55, 0 }
 0x249   : > { %v1000_v11 = vmul.f32 %v984_v7, %v2269_v63  ;;  %v765_v14 = vmul.f32 %v749_v9, %v717_v5 }
 0x24a   : > { %v691_v13 = vpop.permute.xlu2 %690 }
 0x24b   : > { %v1008_v15 = vadd.f32 %v1000_v11, %v992_v8  ;;  %v773_v23 = vadd.f32 %v765_v14, %v741_v17  ;;  %v713_v27 = vsel %vm710_vm8, %v667_v51, %v691_v13  ;;  %v719_v51 = vperm.slane %v2256_v39, 0 }
 0x24c   : > { %v761_v47 = vmul.f32 %v745_v31, %v713_v27  ;;  %v553_v14 = vrot.slane %v2250_v37, 7 }
 0x24d   : > { %v787_v45 = vrot.slane %v773_v23, 4  ;;  %v735_v31 = vmul.f32 %v719_v51, %v2148_v10  ;;  %v990_v10 = vmul.f32 %v2189_v21, %v720_v4  ;;  %v1019_v12 = vrot.slane %v1008_v15, 4 }
 0x24e   : > { %v769_v56 = vadd.f32 %v761_v47, %v737_v50  ;;  %v544_v23 = vrot.slane %v2256_v39, 7  ;;  %v551_v21 = vrot.slane %v2250_v37, 5 }
 0x24f   : > { %v970_v25 = vpop.permute.xlu0 %969  ;;  %v695_v29 = vpop.permute.xlu1 %694 }
 0x250   : > { %v987_v30 = vsel %vm710_vm8, %v946_v36, %v970_v25  ;;  %v715_v33 = vsel %vm710_vm8, %v671_v58, %v695_v29  ;;  %v775_v62 = vrot.slane %v769_v56, 4  ;;  %v750_v29 = vperm.slane %v553_v14, 0 }
 0x251   : > { %v1003_v59 = vmul.f32 %v987_v30, %v749_v9  ;;  %v763_v41 = vmul.f32 %v2283_v20, %v715_v33  ;;  %v726_v33 = vperm.slane %v544_v23, 0 }
 0x252   : > { %v936_v43 = vpop.permute.xlu2 %935 }
 0x253   : > { %v2292_v48 = vadd.f32 %v1003_v59, %v995_v24  ;;  %v771_v49 = vadd.f32 %v763_v41, %v739_v38  ;;  %v542_v24 = vrot.slane %v2256_v39, 5  ;;  %v742_v38 = vmul.f32 %v726_v33, %v2178_v18 }
 0x254   : > { %v738_v18 = vmul.f32 %v2271_v0, %v2206_v28 }
 0x255   : > { %v788_v36 = vsel %vm598_vm6, %v787_v45, %v771_v49  ;;  %v724_v41 = vperm.slane %v542_v24, 0 }
 0x257   : > { %v687_v57 = vpop.permute.xlu0 %686  ;;  %v701_v58 = vpop.permute.xlu1 %700  ;;  %v740_v56 = vmul.f32 %v724_v41, %v2217_v32 }
 0x258   : > { %v711_v16 = vsel %vm710_vm8, %v663_v42, %v687_v57 }
 0x259   : > { %v759_v60 = vmul.f32 %v743_v53, %v711_v16 }
 0x25a   : > { %v677_v46 = vpop.permute.xlu2 %676 }
 0x25b   : > { %v767_v9 = vadd.f32 %v759_v60, %v735_v31  ;;  %v718_v30 = vsel %vm710_vm8, %v677_v46, %v701_v58  ;;  %v792_v58 = vperm.slane %v788_v36, %v2038_v40 }
 0x25c   : > { %v766_v59 = vmul.f32 %v750_v29, %v718_v30 }
 0x25d   : > { %v776_v2 = vsel %vm598_vm6, %v775_v62, %v767_v9  ;;  %v813_v9 = vrot.slane %v792_v58, 4 }
 0x25e   : > { %v774_v45 = vadd.f32 %v766_v59, %v742_v38 }
 0x25f   : > { %v960_v5 = vpop.permute.xlu0 %959  ;;  %v665_v42 = vpop.permute.xlu1 %664 }
 0x260   : > { %v982_v7 = vsel %vm710_vm8, %v936_v43, %v960_v5  ;;  %v748_v43 = vperm.slane %v551_v21, 0  ;;  %v793_v16 = vrot.slane %v774_v45, 4 }
 0x261   : > { %v998_v8 = vmul.f32 %v982_v7, %v744_v3  ;;  %v736_v7 = vmul.f32 %v720_v4, %v2192_v22 }
 0x262   : > { %v972_v11 = vpop.permute.xlu2 %971 }
 0x263   : > { %v1006_v6 = vadd.f32 %v998_v8, %v990_v10 }
 0x265   : > { %v1020_v13 = vsel %vm598_vm6, %v1019_v12, %v1006_v6  ;;  %v996_v6 = vmul.f32 %v2203_v26, %v726_v33 }
 0x267   : > { %v669_v17 = vpop.permute.xlu1 %668  ;;  %v948_v25 = vpop.permute.xlu0 %947 }
 0x268   : > { %v988_v55 = vsel %vm710_vm8, %v948_v25, %v972_v11 }
 0x269   : > { %v1004_v10 = vmul.f32 %v988_v55, %v750_v29  ;;  %v994_v29 = vmul.f32 %v2238_v35, %v724_v41 }
 0x26a   : > { %v968_v27 = vpop.permute.xlu2 %967 }
 0x26b   : > { %v1012_v23 = vadd.f32 %v1004_v10, %v996_v6 }
 0x26d   : > { %v1031_v24 = vrot.slane %v1012_v23, 4 }
 0x26f   : > { %v689_v15 = vpop.permute.xlu1 %688  ;;  %v673_v47 = vpop.permute.xlu0 %672 }
 0x270   : > { %v712_v31 = vsel %vm710_vm8, %v665_v42, %v689_v15  ;;  %v780_v42 = vperm.slane %v776_v2, %v2038_v40 }
 0x271   : > { %v760_v5 = vmul.f32 %v744_v3, %v712_v31  ;;  %v989_v3 = vmul.f32 %v2109_v44, %v719_v51 }
 0x272   : > { %v697_v49 = vpop.permute.xlu2 %696  ;;  %v801_v25 = vrot.slane %v780_v42, 4 }
 0x273   : > { %v716_v50 = vsel %vm710_vm8, %v673_v47, %v697_v49  ;;  %v768_v2 = vadd.f32 %v760_v5, %v736_v7 }
 0x274   : > { %v764_v57 = vmul.f32 %v748_v43, %v716_v50 }
 0x276   : > { %v772_v60 = vadd.f32 %v764_v57, %v740_v56 }
 0x277   : > { %v693_v46 = vpop.permute.xlu1 %692  ;;  %v966_v31 = vpop.permute.xlu0 %965 }
 0x278   : > { %v794_v61 = vsel %vm598_vm6, %v793_v16, %v772_v60  ;;  %v714_v62 = vsel %vm710_vm8, %v669_v17, %v693_v46  ;;  %v1013_v17 = vrot.slane %v2261_v52, 4 }
 0x279   : > { %v798_v32 = vperm.slane %v794_v61, %v2038_v40  ;;  %v762_v36 = vmul.f32 %v2269_v63, %v714_v62  ;;  %v1024_v63 = vperm.slane %v1020_v13, %v2038_v40  ;;  %v993_v62 = vmul.f32 %v2228_v34, %v2281_v19 }
 0x27a   : > { %v958_v8 = vpop.permute.xlu2 %957 }
 0x27b   : > { %v811_v11 = vrot.slane %v798_v32, 4  ;;  %v814_v12 = vsel %vm598_vm6, %v798_v32, %v813_v9  ;;  %v770_v28 = vadd.f32 %v762_v36, %v738_v18  ;;  %v981_v0 = vsel %vm710_vm8, %v2263_v54, %v958_v8 }
 0x27c   : > { %v997_v22 = vmul.f32 %v981_v0, %v743_v53  ;;  %v822_v26 = vperm.slane %v814_v12, %v2058_v1  ;;  %v1037_v52 = vrot.slane %v1024_v63, 4  ;;  %v1025_v36 = vrot.slane %v2292_v48, 4 }
 0x27d   : > { %v812_v4 = vsel %vm598_vm6, %v811_v11, %v792_v58  ;;  %v781_v14 = vrot.slane %v770_v28, 4 }
 0x27e   : > { %v1005_v54 = vadd.f32 %v997_v22, %v989_v3  ;;  %v818_v37 = vperm.slane %v812_v4, %v2058_v1  ;;  %v827_v15 = vrot.slane %v822_v26, 4 }
 0x27f   : > { %v782_v44 = vsel %vm598_vm6, %v781_v14, %v768_v2  ;;  %v944_v39 = vpop.permute.xlu1 %943 }
 0x280   : > { %v786_v51 = vperm.slane %v782_v44, %v2038_v40  ;;  %v1014_v53 = vsel %vm598_vm6, %v1013_v17, %v1005_v54  ;;  %v986_v13 = vsel %vm710_vm8, %v944_v39, %v968_v27  ;;  %v823_v49 = vrot.slane %v818_v37, 4 }
 0x281   : > { %v1018_v30 = vperm.slane %v1014_v53, %v2038_v40  ;;  %v1002_v33 = vmul.f32 %v986_v13, %v748_v43 }
 0x282   : > { %v799_v21 = vrot.slane %v786_v51, 4  ;;  %v802_v59 = vsel %vm598_vm6, %v786_v51, %v801_v25 }
 0x283   : > { %v810_v38 = vperm.slane %v802_v59, %v2058_v1  ;;  %v1038_v45 = vsel %vm598_vm6, %v1037_v52, %v1018_v30  ;;  %v1010_v47 = vadd.f32 %v1002_v33, %v994_v29 }
 0x284   : > { %v800_v27 = vsel %vm598_vm6, %v799_v21, %v780_v42  ;;  %v1042_v34 = vperm.slane %v1038_v45, %v2058_v1 }
 0x285   : > { %v806_v35 = vperm.slane %v800_v27, %v2058_v1  ;;  %v828_v41 = vsel %vm598_vm6, %v827_v15, %v810_v38  ;;  %v829_v43 = vrot.slane %v810_v38, 4  ;;  %v1032_v50 = vsel %vm598_vm6, %v1031_v24, %v1010_v47 }
 0x286   : > { %v833_v56 = vpack.c.bf16 %v828_v41, %v828_v41  ;;  %v1036_v32 = vperm.slane %v1032_v50, %v2038_v40 }
 0x287   : > { %v824_v57 = vsel %vm598_vm6, %v823_v49, %v806_v35  ;;  %v825_v58 = vrot.slane %v806_v35, 4  ;;  %v830_v16 = vsel %vm598_vm6, %v822_v26, %v829_v43  ;;  %v942_v60 = vpop.permute.xlu1 %941 }
 0x288   : > { %v831_v55 = vpack.c.bf16 %v824_v57, %v824_v57  ;;  %v834_v46 = vpack.c.bf16 %v830_v16, %v830_v16  ;;  %v985_v18 = vsel %vm710_vm8, %v942_v60, %v966_v31  ;;  %838 = vst.msk [vmem:[%s455_s23 + $0x8] sm:$0xf] %vm835_vm7, %v833_v56 }
 0x289   : > { %v826_v61 = vsel %vm598_vm6, %v818_v37, %v825_v58  ;;  %v1001_v9 = vmul.f32 %v985_v18, %v2283_v20 }
 0x28a   : > { %v832_v5 = vpack.c.bf16 %v826_v61, %v826_v61  ;;  %836 = vst.msk [vmem:[%s455_s23] sm:$0xf] %vm835_vm7, %v831_v55 }
 0x28b   : > { %v1009_v7 = vadd.f32 %v1001_v9, %v993_v62  ;;  %839 = vst.msk [vmem:[%s455_s23 + $0xc] sm:$0xf] %vm835_vm7, %v834_v46 }
 0x28c   : > { %837 = vst.msk [vmem:[%s455_s23 + $0x4] sm:$0xf] %vm835_vm7, %v832_v5 }
 0x28d   : > { %v1026_v19 = vsel %vm598_vm6, %v1025_v36, %v1009_v7 }
 0x28e   : > { %1739 = shalt.err (!%p1736_p9)
}
 0x28f   : > { %s2484_s23 = smov 64   ;;  %s2498_s2 = smov 4   ;;  %v1043_v20 = vrot.slane %v1036_v32, 4  ;;  %v1030_v48 = vperm.slane %v1026_v19, %v2038_v40  ;;  %v1051_v10 = vrot.slane %v1042_v34, 4 }
 0x290   : > { %1560 = dma.vmem_to_hbm [thread:$0]  (%p1964_p4), %s1211_s25, 256, %s1213_s17, %s1185_s27, %s2484_s23, %s2484_s23, %s2498_s2  }
 0x291   : > { %v1044_v42 = vsel %vm598_vm6, %v1043_v20, %v1030_v48  ;;  %s1229_s20 = scalar_lea.hbm %s2477_s8, %s1550_s26  ;;  %s1249_s18 = scalar_lea.hbm %s2478_s9, %s1550_s26 }
 0x292   : > { %v1048_v8 = vperm.slane %v1044_v42, %v2058_v1  ;;  %s1189_s12 = sand.u32 1, %s1952_s15   ;;  %s2499_s17 = sshll.u32 %s2132_s16, 3 }
 0x293   : > { %s462_s25 = scalar_lea.vmem [#allocation9], %s2499_s17  ;;  %s1232_s23 = sshll.u32 %s1229_s20, 4  ;;  %s1233_s23 = int_to_ptr.hbm [resolvable:$true] %s1232_s23 }
 0x294   : > { %v1049_v11 = vrot.slane %v1048_v8, 4  ;;  %v1052_v12 = vsel %vm598_vm6, %v1048_v8, %v1051_v10  ;;  %s1230_s27 = sshll.u32 %s462_s25, 4  ;;  %s1252_s3 = sshll.u32 %s1249_s18, 4  ;;  %s1231_s27 = int_to_ptr.vmem [resolvable:$true] %s1230_s27  ;;  %s2407_s3 = int_to_ptr.hbm [resolvable:$true] %s1252_s3 }
 0x295   : > { %v1054_v40 = vpack.c.bf16 %v1052_v12, %v1052_v12  ;;  %s1250_s1 = sshll.u32 %s2157_s24, 4  ;;  %s2412_s15 = scalar_lea.sflag [#allocation10], %s1189_s12  ;;  %s2409_s1 = int_to_ptr.vmem [resolvable:$true] %s1250_s1 }
 0x296   : > { %v1050_v28 = vsel %vm598_vm6, %v1049_v11, %v1042_v34  ;;  %s1754_s16 = sshra.s32 %s1233_s23, 4  ;;  %s1760_s20 = scalar_lea.hbm %s2477_s8, 16  ;;  %s1755_s16 = int_to_ptr.hbm [resolvable:$true] %s1754_s16 }
 0x297   : > { %v1053_v0 = vpack.c.bf16 %v1050_v28, %v1050_v28  ;;  %1056 = vst.msk [vmem:[%s462_s25 + $0x4] sm:$0xf] %vm835_vm7, %v1054_v40  ;;  %s1756_s26 = scalar_lea.hbm %s1755_s16, 8  ;;  %p1761_p13 = scmp.lt.s32.totalorder %s1755_s16, %s2477_s8 }
 0x298   : > { %p1757_p10 = scmp.ne.s32.totalorder %s1755_s16, %s1756_s26  ;;  %p1762_p0 = scmp.lt.s32.totalorder %s1760_s20, %s1756_s26 }
 0x299   : > { %1055 = vst.msk [vmem:[%s462_s25] sm:$0xf] %vm835_vm7, %v1053_v0 }
 0x29a   : > { %p1758_p11 = pnand %p1757_p10, %p1964_p4  ;;  %p1763_p1 = por %p1762_p0, %p1761_p13 }
 0x29c   : > { %p1759_p12 = pneg %p1758_p11 }
 0x29e   : > { %p1764_p2 = pnand %p1763_p1, %p1759_p12 }
 0x2a0   : > { %1767 = shalt.err (!%p1764_p2)
}
 0x2a1   : > { %s2500_s18 = smov 64   ;;  %s1782_s12 = sshra.s32 %s2407_s3, 4  ;;  %s1783_s12 = int_to_ptr.hbm [resolvable:$true] %s1782_s12 }
 0x2a2   : > { %1561 = dma.vmem_to_hbm [thread:$0]  (%p1964_p4), %s1231_s27, 128, %s1233_s23, %s2412_s15, %s2500_s18, %s2500_s18, %s2498_s2  }
 0x2a3   : > { %s1784_s17 = scalar_lea.hbm %s1783_s12, 8  ;;  %s1788_s26 = scalar_lea.hbm %s2478_s9, 16 }
 0x2a4   : > { %p1785_p3 = scmp.ne.s32.totalorder %s1783_s12, %s1784_s17  ;;  %p1789_p7 = scmp.lt.s32.totalorder %s1783_s12, %s2478_s9 }
 0x2a5   : > { %p1790_p9 = scmp.lt.s32.totalorder %s1788_s26, %s1784_s17 }
 0x2a6   : > { %p1786_p5 = pnand %p1785_p3, %p1964_p4 }
 0x2a7   : > { %p1791_p10 = por %p1790_p9, %p1789_p7 }
 0x2a8   : > { %p1787_p6 = pneg %p1786_p5 }
 0x2aa   : > { %p1792_p11 = pnand %p1791_p10, %p1787_p6 }
 0x2ac   : > { %1795 = shalt.err (!%p1792_p11)
}
 0x2ad   : > { %1562 = dma.vmem_to_hbm [thread:$0]  (%p1964_p4), %s2409_s1, 128, %s2407_s3, %s2412_s15, %s2500_s18, %s2500_s18, %s2498_s2  }
 0x2ae PF: > { %p1587_p12 = scmp.ge.s32.totalorder %s1858_s14, 2  ;;  %s1267_s23 = sand.u32 1, %s1838_s30  }
 0x2af   : > { %s1268_s27 = scalar_lea.sflag [#allocation5], %s1267_s23 }
 0x2b0   : > { %p1574_p13 = pnand %p1587_p12, %p1973_p8 }
 0x2b2   : > { %p1575_p0 = pneg %p1574_p13 }
 0x2b4   : > { %1829 = dma.done.wait (%p1575_p0), %s1268_s27, 256  }
 0x2b5   : > { %1831 = vsyncadd (%p1575_p0), %s1268_s27, 4294967040  ;;  %s2501_s19 = sadd.s32 4294967294, %s1858_s14  }
 0x2b6   : > { %s1277_s20 = sand.u32 1, %s2501_s19  }
 0x2b7   : > { %s1278_s28 = scalar_lea.sflag [#allocation10], %s1277_s20 }
 0x2b8   : > { %1833 = dma.done.wait (%p1575_p0), %s1278_s28, 256  }
 0x2b9   : > { %1835 = vsyncadd (%p1575_p0), %s1278_s28, 4294967040  ;;  %s28_s14 = sadd.s32 1, %s1858_s14   ;;  %s2502_s2 = sld [smem:[#allocation16_spill]] }
 0x2ba   : > { %p25_p4 = scmp.ge.s32.totalorder %s28_s14, 4   ;;  %s2503_s30 = smov %s1842_s10 }
 0x2bb   : > { %s2504_s10 = smov %s1846_s11  ;;  %s2505_s11 = smov %s1979_s22 }
 0x2bc   : > { %s2506_s12 = smov %s1854_s13  ;;  %27 = sbr.rel (!%p25_p4) target bundleno = 13 (0xd), region = 141 }
 0x2bf   : > { %s2507_s13 = smov %s2502_s2 }
 0x2c1   :  { %1294 = vsyncpa [#allocation4], 1 }
 0x2c2   :  { %1296 = vsyncpa [#allocation4 + $0x1], 1 }
 0x2c3   :  { %1297 = vsyncpa [#allocation7], 1 }
 0x2c4   :  { %1298 = vsyncpa [#allocation5], 1 }
 0x2c5   :  { %1300 = vsyncpa [#allocation5 + $0x1], 1 }
 0x2c6   :  { %1301 = vsyncpa [#allocation10], 1 }
 0x2c7   :  { %1303 = vsyncpa [#allocation10 + $0x1], 1 }

</bundles_post_ra>
